<compile_context>
chip_gen: v5e
topology: v5e:2x2
jax: 0.10.0
libtpu: 0.0.40
codegen_flags: <defaults>
</compile_context>

<pallas_src>
import math

import jax
import jax.numpy as jnp
from jax.experimental import pallas as pl
from jax.experimental.pallas import tpu as pltpu


def _gru_linear_kernel(h_ref, x_ref, wh_ref, wx_ref, b_ref, o_ref):
    # h_ref : (TM, K)  hidden-state rows      -> MXU matmul, f32 accumulation
    # x_ref : (TM, 1)  input column           -> rank-1 term on the VPU
    # wh_ref: (K, N)   = weights[1:, :]       (resident in VMEM)
    # wx_ref: (1, N)   = weights[0:1, :]      (resident in VMEM)
    # b_ref : (1, N)   bias                   (resident in VMEM)
    acc = jnp.dot(h_ref[...], wh_ref[...], preferred_element_type=jnp.float32)
    acc = acc + x_ref[...] * wx_ref[...] + b_ref[...]
    o_ref[...] = acc.astype(o_ref.dtype)


def _round_up(x, m):
    return ((x + m - 1) // m) * m


def gru_linear(inputs, hidden_state, weights, biases, num_gru_units, output_dim,
               tile_m: int = 4096):
    """Pallas implementation of GRULinear.forward.

    inputs:       (B, num_nodes)                 f32
    hidden_state: (B, num_nodes * num_gru_units) f32
    weights:      (num_gru_units + 1, output_dim)
    biases:       (output_dim,)
    returns:      (B, num_nodes * output_dim)
    """
    B, n_nodes = inputs.shape
    M = B * n_nodes
    K = num_gru_units
    N = output_dim

    # Row-major reshapes only: no concatenated (M, K+1) matrix is materialized.
    h2d = hidden_state.reshape(M, K).astype(jnp.float32)
    x2d = inputs.reshape(M, 1).astype(jnp.float32)

    # Split the weight matrix: row 0 multiplies the input column, rows 1..K feed
    # the MXU against the hidden state.  Keeps K a clean multiple of 8.
    wx = weights[0:1, :].astype(jnp.float32)   # (1, N)
    wh = weights[1:, :].astype(jnp.float32)    # (K, N)
    b = biases.reshape(1, N).astype(jnp.float32)

    # Tile over rows. Per-step footprint is tiny (K=G, N=output_dim), so a large
    # row tile amortizes the ~0.35us per-grid-step overhead on every generation
    # (double-buffered footprint stays well under the 16 MiB v5e scoped default).
    tm = max(8, min(tile_m, _round_up(M, 8)))
    m_pad = _round_up(M, tm)
    if m_pad != M:
        pad = m_pad - M
        h2d = jnp.pad(h2d, ((0, pad), (0, 0)))
        x2d = jnp.pad(x2d, ((0, pad), (0, 0)))

    grid = (m_pad // tm,)

    cost = pl.CostEstimate(
        flops=2 * m_pad * K * N + 2 * m_pad * N,
        transcendentals=0,
        bytes_accessed=4 * (m_pad * (K + 1 + N) + (K + 1) * N + N),
    )

    # TODO(synk): when used inside the full GRU cell, fuse the gate/candidate
    # matmuls into a single call (N = 2*output_dim / 3*output_dim) so the output
    # becomes lane-dense and the hidden-state stream is read from HBM only once.
    out = pl.pallas_call(
        _gru_linear_kernel,
        out_shape=jax.ShapeDtypeStruct((m_pad, N), jnp.float32),
        grid_spec=pltpu.PrefetchScalarGridSpec(
            num_scalar_prefetch=0,
            grid=grid,
            in_specs=[
                pl.BlockSpec((tm, K), lambda i: (i, 0)),   # streamed hidden rows
                pl.BlockSpec((tm, 1), lambda i: (i, 0)),   # streamed input column
                pl.BlockSpec((K, N), lambda i: (0, 0)),    # resident W[1:, :]
                pl.BlockSpec((1, N), lambda i: (0, 0)),    # resident W[0, :]
                pl.BlockSpec((1, N), lambda i: (0, 0)),    # resident bias
            ],
            out_specs=pl.BlockSpec((tm, N), lambda i: (i, 0)),
        ),
        compiler_params=pltpu.CompilerParams(
            dimension_semantics=("parallel",),  # rows independent -> megacore-shardable
        ),
        cost_estimate=cost,
    )(h2d, x2d, wh, wx, b)

    return out[:M].reshape(B, n_nodes * N)


def init_params(key, num_gru_units, output_dim, bias_init=0.0):
    """Xavier-uniform weights + constant bias (matches reset_parameters)."""
    fan_in, fan_out = num_gru_units + 1, output_dim
    bound = math.sqrt(6.0 / (fan_in + fan_out))
    weights = jax.random.uniform(
        key, (fan_in, fan_out), dtype=jnp.float32, minval=-bound, maxval=bound
    )
    biases = jnp.full((output_dim,), bias_init, dtype=jnp.float32)
    return weights, biases


if __name__ == "__main__":
    # Small shapes consistent with the module's forward.
    batch = 2
    num_nodes = 16
    num_gru_units = 32
    output_dim = 8

    key = jax.random.PRNGKey(0)
    k_w, k_x, k_h = jax.random.split(key, 3)

    weights, biases = init_params(k_w, num_gru_units, output_dim, bias_init=0.0)
    inputs = jax.random.normal(k_x, (batch, num_nodes), dtype=jnp.float32)
    hidden_state = jax.random.normal(
        k_h, (batch, num_nodes * num_gru_units), dtype=jnp.float32
    )

    out = gru_linear(inputs, hidden_state, weights, biases, num_gru_units, output_dim)
    out = jax.block_until_ready(out)

    # Pure-JAX reference (mirrors the PyTorch forward exactly, with the concat).
    x = inputs.reshape(batch, num_nodes, 1)
    h = hidden_state.reshape(batch, num_nodes, num_gru_units)
    cat = jnp.concatenate([x, h], axis=2).reshape(-1, num_gru_units + 1)
    ref = (cat @ weights + biases).reshape(batch, num_nodes * output_dim)

    assert out.shape == (batch, num_nodes * output_dim)
    assert jnp.allclose(out, ref, atol=1e-5, rtol=1e-5)

    print("KERNEL_OK")
</pallas_src>

<mosaic_0001>
module attributes {stable_mosaic.version = 11 : i64} {
  func.func @_gru_linear_kernel(%arg0: i32, %arg1: memref<32x32xf32, #tpu.memory_space<vmem>>, %arg2: memref<32x1xf32, #tpu.memory_space<vmem>>, %arg3: memref<32x8xf32, #tpu.memory_space<vmem>>, %arg4: memref<1x8xf32, #tpu.memory_space<vmem>>, %arg5: memref<1x8xf32, #tpu.memory_space<vmem>>, %arg6: memref<32x8xf32, #tpu.memory_space<vmem>>) attributes {dimension_semantics = [#tpu.dimension_semantics<parallel>], iteration_bounds = array<i64: 1>, scalar_prefetch = 0 : i64, scratch_operands = 0 : i64, tpu.core_type = #tpu.core_type<tc>, window_params = [{transform_indices = @transform_0, window_bounds = array<i64: 32, 32>}, {transform_indices = @transform_1, window_bounds = array<i64: 32, 1>}, {pipeline_mode = #tpu.pipeline_mode<synchronous>, transform_indices = @transform_2, window_bounds = array<i64: 32, 8>}, {pipeline_mode = #tpu.pipeline_mode<synchronous>, transform_indices = @transform_3, window_bounds = array<i64: 1, 8>}, {pipeline_mode = #tpu.pipeline_mode<synchronous>, transform_indices = @transform_4, window_bounds = array<i64: 1, 8>}, {transform_indices = @transform_5, window_bounds = array<i64: 32, 8>}]} {
    %c0 = arith.constant 0 : index
    %c0_0 = arith.constant 0 : index
    %0 = vector.load %arg1[%c0, %c0_0] : memref<32x32xf32, #tpu.memory_space<vmem>>, vector<32x32xf32>
    %c0_1 = arith.constant 0 : index
    %c0_2 = arith.constant 0 : index
    %1 = vector.load %arg3[%c0_1, %c0_2] : memref<32x8xf32, #tpu.memory_space<vmem>>, vector<32x8xf32>
    %cst = arith.constant dense<0.000000e+00> : vector<32x8xf32>
    %2 = tpu.matmul %0, %1, %cst {dimension_numbers = #tpu.dot_dimension_numbers<[1], [0], [0], [1], [0, 0, 1, 1], [], []>} : vector<32x32xf32>, vector<32x8xf32>, vector<32x8xf32> -> vector<32x8xf32>
    %c0_3 = arith.constant 0 : index
    %c0_4 = arith.constant 0 : index
    %3 = vector.load %arg2[%c0_3, %c0_4] : memref<32x1xf32, #tpu.memory_space<vmem>>, vector<32x1xf32>
    %c0_5 = arith.constant 0 : index
    %c0_6 = arith.constant 0 : index
    %4 = vector.load %arg4[%c0_5, %c0_6] : memref<1x8xf32, #tpu.memory_space<vmem>>, vector<1x8xf32>
    %5 = vector.broadcast %3 : vector<32x1xf32> to vector<32x8xf32>
    %6 = vector.broadcast %4 : vector<1x8xf32> to vector<32x8xf32>
    %7 = arith.mulf %5, %6 : vector<32x8xf32>
    %8 = arith.addf %2, %7 : vector<32x8xf32>
    %c0_7 = arith.constant 0 : index
    %c0_8 = arith.constant 0 : index
    %9 = vector.load %arg5[%c0_7, %c0_8] : memref<1x8xf32, #tpu.memory_space<vmem>>, vector<1x8xf32>
    %10 = vector.broadcast %9 : vector<1x8xf32> to vector<32x8xf32>
    %11 = arith.addf %8, %10 : vector<32x8xf32>
    %c0_9 = arith.constant 0 : index
    %c0_10 = arith.constant 0 : index
    %12 = vector.load %arg6[%c0_9, %c0_10] : memref<32x8xf32, #tpu.memory_space<vmem>>, vector<32x8xf32>
    tpu.vector_store %arg6[%c0_9, %c0_10], %11 {strides = array<i32>} : memref<32x8xf32, #tpu.memory_space<vmem>>, vector<32x8xf32>,
    return
  }
  func.func @transform_0(%arg0: i32) -> (i32, i32) {
    %c0_i32 = arith.constant 0 : i32
    %c0_i32_0 = arith.constant 0 : i32
    return %arg0, %c0_i32 : i32, i32
  }
  func.func @transform_1(%arg0: i32) -> (i32, i32) {
    %c0_i32 = arith.constant 0 : i32
    %c0_i32_0 = arith.constant 0 : i32
    return %arg0, %c0_i32 : i32, i32
  }
  func.func @transform_2(%arg0: i32) -> (i32, i32) {
    %c0_i32 = arith.constant 0 : i32
    %c0_i32_0 = arith.constant 0 : i32
    %c0_i32_1 = arith.constant 0 : i32
    return %c0_i32, %c0_i32_0 : i32, i32
  }
  func.func @transform_3(%arg0: i32) -> (i32, i32) {
    %c0_i32 = arith.constant 0 : i32
    %c0_i32_0 = arith.constant 0 : i32
    %c0_i32_1 = arith.constant 0 : i32
    return %c0_i32, %c0_i32_0 : i32, i32
  }
  func.func @transform_4(%arg0: i32) -> (i32, i32) {
    %c0_i32 = arith.constant 0 : i32
    %c0_i32_0 = arith.constant 0 : i32
    %c0_i32_1 = arith.constant 0 : i32
    return %c0_i32, %c0_i32_0 : i32, i32
  }
  func.func @transform_5(%arg0: i32) -> (i32, i32) {
    %c0_i32 = arith.constant 0 : i32
    %c0_i32_0 = arith.constant 0 : i32
    return %arg0, %c0_i32 : i32, i32
  }
}

</mosaic_0001>

<bundles_post_ra>
// kernel: tpu_custom_call.1
= control target key start
LH: loop header
LB: loop body
LE: loop exit
PB: predicated region body
PF: predicated region fallthrough
CT: control target
= control target key end

     0   :  { %v140_v2 = vmov 0   ;;  %vm60_vm0 = vcmask 261120   ;;  %vm110_vm1 = vcmask 64512   ;;  %s225_s2 = inlined_call_operand.vmem [shape: f32[32,8], index: 2, kind: input, shape index: {}]   ;;  %s226_s1 = inlined_call_operand.vmem [shape: f32[32,1], index: 1, kind: input, shape index: {}]   ;;  %s227_s3 = inlined_call_operand.vmem [shape: f32[1,8], index: 3, kind: input, shape index: {}]   ;;  %s228_s0 = inlined_call_operand.vmem [shape: f32[32,32], index: 0, kind: input, shape index: {}]   ;;  %s229_s4 = inlined_call_operand.vmem [shape: f32[1,8], index: 4, kind: input, shape index: {}]   ;;  %s230_s5 = inlined_call_operand.vmem [shape: f32[32,8], index: 5, kind: output, shape index: {}]  }
   0x1   :  { %v27_v0 = vld [vmem:[%s225_s2 + $0x18] sm:$0xff]  ;;  %v26_v1 = vld [vmem:[%s225_s2 + $0x10] sm:$0xff]  ;;  %137 = vset.pattern.permute.xlu1 %v140_v2  ;;  %136 = vset.pattern.permute.xlu0 %v140_v2  ;;  %v25_v3 = vld [vmem:[%s225_s2 + $0x8] sm:$0xff] }
   0x2   :  { %85 = vmatpush.msra.mxu0 %v27_v0  ;;  %123 = vmatpush.msra.mxu1 %v27_v0  ;;  %v24_v4 = vld [vmem:[%s225_s2] sm:$0xff]  ;;  %v30_v5 = vld [vmem:[%s226_s1 + $0x10] sm:$0xff]  ;;  %v21_v8 = vld [vmem:[%s228_s0 + $0x8] sm:$0xff] }
   0x3   :  { %124 = vmatpush.msra.mxu2 %v27_v0  ;;  %125 = vmatpush.msra.mxu3 %v27_v0  ;;  %v28_v6 = vld [vmem:[%s226_s1] sm:$0xff]  ;;  %v22_v9 = vld [vmem:[%s228_s0 + $0x10] sm:$0xff]  ;;  %v23_v10 = vld [vmem:[%s228_s0 + $0x18] sm:$0xff] }
   0x4   :  { %86 = vmatpush.msra.mxu0 %v26_v1  ;;  %126 = vmatpush.msra.mxu1 %v26_v1  ;;  %v20_v7 = vld [vmem:[%s228_s0] sm:$0xff]  ;;  %v31_v11 = vld [vmem:[%s226_s1 + $0x18] sm:$0xff]  ;;  %v29_v12 = vld [vmem:[%s226_s1 + $0x8] sm:$0xff] }
   0x5   :  { %127 = vmatpush.msra.mxu2 %v26_v1  ;;  %128 = vmatpush.msra.mxu3 %v26_v1  ;;  %v138_v15 = vld [vmem:[%s227_s3] ss:$0 sm:$0xff] }
   0x6   :  { %87 = vmatpush.msra.mxu0 %v25_v3  ;;  %129 = vmatpush.msra.mxu1 %v25_v3  ;;  %v139_v19 = vld [vmem:[%s229_s4] ss:$0 sm:$0xff] }
   0x7   :  { %130 = vmatpush.msra.mxu2 %v25_v3  ;;  %131 = vmatpush.msra.mxu3 %v25_v3 }
   0x8   :  { %88 = vmatpush.msra.mxu0 %v24_v4  ;;  %132 = vmatpush.msra.mxu1 %v24_v4 }
   0x9   :  { %133 = vmatpush.msra.mxu2 %v24_v4  ;;  %134 = vmatpush.msra.mxu3 %v24_v4 }
   0xa   :  { %45 = vperm.xlu1 %137, %v30_v5   ;;  %35 = vperm.xlu0 %136, %v28_v6  }
   0xb   :  { %119 = vmatmul.msk.f32.vlgmr.msra.gmra.mxu0 %vm60_vm0, %v20_v7  ;;  %120 = vmatmul.msk.f32.vlgmr.msra.gmra.mxu1 %vm60_vm0, %v21_v8 }
   0xc   :  { %121 = vmatmul.msk.f32.vlgmr.msra.gmra.mxu2 %vm60_vm0, %v22_v9  ;;  %122 = vmatmul.msk.f32.vlgmr.msra.gmra.mxu3 %vm60_vm0, %v23_v10 }
  0x12   :  { %50 = vperm.xlu1 %137, %v31_v11   ;;  %40 = vperm.xlu0 %136, %v29_v12  }
  0x7c   :  { %v36_v13 = vpop.permute.xlu0 %35  ;;  %v46_v14 = vpop.permute.xlu1 %45 }
  0x7d   :  { %v56_v17 = vmul.f32 %v138_v15, %v36_v13  ;;  %v58_v27 = vmul.f32 %v138_v15, %v46_v14 }
  0x84   :  { %v41_v16 = vpop.permute.xlu0 %40  ;;  %v51_v24 = vpop.permute.xlu1 %50 }
  0x85   :  { %v57_v18 = vmul.f32 %v138_v15, %v41_v16  ;;  %v59_v28 = vmul.f32 %v138_v15, %v51_v24 }
  0x88   :  { %v90_v20 = vpop.f32.mrf.mxu0  ;;  %v93_v21 = vpop.f32.mrf.mxu1 }
  0x89   :  { %v91_v22 = vadd.f32 %v90_v20, %v56_v17  ;;  %v94_v23 = vadd.f32 %v93_v21, %v57_v18 }
  0x8b   :  { %v106_v25 = vadd.f32 %v139_v19, %v91_v22  ;;  %v107_v26 = vadd.f32 %v139_v19, %v94_v23 }
  0x8d   :  { %111 = vst.msk [vmem:[%s230_s5] sm:$0xff] %vm110_vm1, %v106_v25 }
  0x8e   :  { %112 = vst.msk [vmem:[%s230_s5 + $0x8] sm:$0xff] %vm110_vm1, %v107_v26 }
  0x8f   :  { %v96_v29 = vpop.f32.mrf.mxu2  ;;  %v99_v30 = vpop.f32.mrf.mxu3 }
  0x90   :  { %v97_v31 = vadd.f32 %v96_v29, %v58_v27  ;;  %v100_v32 = vadd.f32 %v99_v30, %v59_v28 }
  0x92   :  { %v108_v33 = vadd.f32 %v139_v19, %v97_v31  ;;  %v109_v34 = vadd.f32 %v139_v19, %v100_v32 }
  0x94   :  { %113 = vst.msk [vmem:[%s230_s5 + $0x10] sm:$0xff] %vm110_vm1, %v108_v33 }
  0x95   :  { %114 = vst.msk [vmem:[%s230_s5 + $0x18] sm:$0xff] %vm110_vm1, %v109_v34 }

</bundles_post_ra>
